<compile_context>
chip_gen: v7x
topology: tpu7x:2x2x1
jax: 0.10.0
libtpu: 0.0.40
codegen_flags: <defaults>
</compile_context>

<pallas_src>
import jax
import jax.numpy as jnp
from jax import lax
from jax.experimental import pallas as pl
from jax.experimental.pallas import tpu as pltpu


def _round_up(x, m):
    return ((x + m - 1) // m) * m


def _const_spec(shape):
    """Same block at every grid step -> fetched once, resident in VMEM.

    Single-buffered (pl.Buffered(1)) so the never-changing inputs don't get
    duplicated by the default double-buffering (matters most on v7x's 64 MiB).
    """
    idx = lambda i, *_: (0,) * len(shape)
    try:
        return pl.BlockSpec(shape, idx, pipeline_mode=pl.Buffered(buffer_count=1))
    except (TypeError, AttributeError):
        # Fallback for BlockSpec variants without pipeline_mode support.
        return pl.BlockSpec(shape, idx)


def _vmem_limit(bytes_needed):
    """Per-generation scoped-VMEM limit (v5e/v6e ~128 MiB, v7x 64 MiB)."""
    try:
        cap = int(pltpu.get_tpu_info().vmem_capacity_bytes)
    except Exception:
        cap = 64 << 20  # conservative (v7x-sized) fallback
    cap = max(int(cap * 0.85), 16 << 20)  # leave headroom for the compiler
    return int(min(max(2 * int(bytes_needed) + (1 << 20), 32 << 20), cap))


def _pad_params(w1, b1, w2, b2, f, h, o, f_pad, h_pad, o_pad):
    w1_p = jnp.zeros((f_pad, h_pad), jnp.float32).at[:f, :h].set(w1.astype(jnp.float32))
    b1_p = jnp.zeros((1, h_pad), jnp.float32).at[0, :h].set(b1.astype(jnp.float32))
    w2_p = jnp.zeros((h_pad, o_pad), jnp.float32).at[:h, :o].set(w2.astype(jnp.float32))
    b2_p = jnp.zeros((1, o_pad), jnp.float32).at[0, :o].set(b2.astype(jnp.float32))
    return w1_p, b1_p, w2_p, b2_p


# ----------------------------------------------------------------------------
# Path 1: dense adjacency on the MXU (small / medium graphs).
# ----------------------------------------------------------------------------
def _forward_dense(nodes, edges, w1, b1, w2, b2):
    n, f = nodes.shape
    h, o = w1.shape[1], w2.shape[1]
    f_pad = _round_up(max(f, 1), 128)
    h_pad = _round_up(max(h, 1), 128)
    o_pad = _round_up(max(o, 1), 128)
    tm = min(128, _round_up(max(n, 1), 8))
    n_pad = _round_up(n, tm)

    edges = edges.astype(jnp.int32)
    src = jnp.clip(edges[:, 0], 0, n - 1)
    dst = jnp.clip(edges[:, 1], 0, n - 1)
    # Multi-adjacency: duplicate edges accumulate, matching the PyTorch loop.
    adj = jnp.zeros((n_pad, n_pad), jnp.float32).at[dst, src].add(1.0)

    nodes_p = jnp.zeros((n_pad, f_pad), jnp.float32).at[:n, :f].set(
        nodes.astype(jnp.float32))
    w1_p, b1_p, w2_p, b2_p = _pad_params(w1, b1, w2, b2, f, h, o, f_pad, h_pad, o_pad)

    def kernel(a_ref, nodes_ref, w1_ref, b1_ref, w2_ref, b2_ref, out_ref):
        # Neighbor aggregation as one MXU matmul over the full node table.
        agg = jnp.dot(a_ref[...], nodes_ref[...], preferred_element_type=jnp.float32)
        hh = jnp.maximum(
            jnp.dot(agg, w1_ref[...], preferred_element_type=jnp.float32) + b1_ref[...],
            0.0)
        out = jnp.dot(hh, w2_ref[...], preferred_element_type=jnp.float32) + b2_ref[...]
        out_ref[...] = out.astype(out_ref.dtype)

    flops = (2 * n_pad * n_pad * f_pad
             + 2 * n_pad * f_pad * h_pad
             + 2 * n_pad * h_pad * o_pad)
    bytes_accessed = 4 * (n_pad * n_pad + n_pad * f_pad + f_pad * h_pad + h_pad
                          + h_pad * o_pad + o_pad + n_pad * o_pad)
    resident = 4 * (n_pad * f_pad + f_pad * h_pad + h_pad + h_pad * o_pad + o_pad)
    streamed = 2 * 4 * (tm * n_pad + tm * o_pad)  # double-buffered A / out tiles

    out_p = pl.pallas_call(
        kernel,
        out_shape=jax.ShapeDtypeStruct((n_pad, o_pad), jnp.float32),
        grid=(n_pad // tm,),
        in_specs=[
            pl.BlockSpec((tm, n_pad), lambda i: (i, 0)),  # adjacency row tile (streamed)
            _const_spec((n_pad, f_pad)),                  # node table (resident)
            _const_spec((f_pad, h_pad)),                  # w1
            _const_spec((1, h_pad)),                      # b1
            _const_spec((h_pad, o_pad)),                  # w2
            _const_spec((1, o_pad)),                      # b2
        ],
        out_specs=pl.BlockSpec((tm, o_pad), lambda i: (i, 0)),
        compiler_params=pltpu.CompilerParams(
            dimension_semantics=("parallel",),
            vmem_limit_bytes=_vmem_limit(resident + streamed)),
        cost_estimate=pl.CostEstimate(flops=flops, transcendentals=0,
                                      bytes_accessed=bytes_accessed),
    )(adj, nodes_p, w1_p, b1_p, w2_p, b2_p)
    return out_p[:n, :o]


# ----------------------------------------------------------------------------
# Path 2: CSR-by-destination gather-sum (large graphs).
# ----------------------------------------------------------------------------
def _forward_csr(nodes, edges, w1, b1, w2, b2):
    n, f = nodes.shape
    h, o = w1.shape[1], w2.shape[1]
    f_pad = _round_up(max(f, 1), 128)
    h_pad = _round_up(max(h, 1), 128)
    o_pad = _round_up(max(o, 1), 128)
    tm = min(64, _round_up(max(n, 1), 8))  # 8-row groups; group loop statically unrolled
    n_pad = _round_up(n, tm)
    n_groups = tm // 8
    n_edges = int(edges.shape[0])

    # CSR-by-destination edge structure (scalar prefetch: row_ptr + src only;
    # the destination row is implied by the segment being iterated).
    edges = edges.astype(jnp.int32)
    src = jnp.clip(edges[:, 0], 0, n - 1)
    dst = jnp.clip(edges[:, 1], 0, n - 1)
    order = jnp.argsort(dst)
    src_sorted = src[order]
    counts = jnp.zeros((n_pad,), jnp.int32).at[dst[order]].add(1)
    row_ptr = jnp.concatenate(
        [jnp.zeros((1,), jnp.int32), jnp.cumsum(counts).astype(jnp.int32)])
    if n_edges == 0:
        src_sorted = jnp.zeros((1,), jnp.int32)  # keep SMEM array non-empty

    # Node table without sublane padding: node s lives at [s // 8, s % 8, :].
    nodes2 = jnp.zeros((n_pad, f_pad), jnp.float32).at[:n, :f].set(
        nodes.astype(jnp.float32))
    nodes_p = nodes2.reshape(n_pad // 8, 8, f_pad)
    w1_p, b1_p, w2_p, b2_p = _pad_params(w1, b1, w2, b2, f, h, o, f_pad, h_pad, o_pad)

    def kernel(row_ptr_ref, src_ref,                       # SMEM (scalar prefetch)
               nodes_ref, w1_ref, b1_ref, w2_ref, b2_ref,  # VMEM (resident)
               out_ref):                                   # VMEM output tile
        base = pl.program_id(0) * tm
        sub_iota = lax.broadcasted_iota(jnp.int32, (8, f_pad), 0)
        zero_row = jnp.zeros((1, f_pad), jnp.float32)

        def gather_row(e):
            s = src_ref[e]
            grp = nodes_ref[s // 8]                          # (8, f_pad) leading-axis gather
            pick = jnp.where(sub_iota == (s % 8), grp, 0.0)  # keep source sublane
            return jnp.sum(pick, axis=0, keepdims=True)      # (1, f_pad)

        groups = []
        for g in range(n_groups):  # static unroll -> all stores are static-shaped
            def row_body(r, group_acc, g=g):
                row = base + g * 8 + r
                start = row_ptr_ref[row]
                stop = row_ptr_ref[row + 1]
                n_e = stop - start

                # Edge loop unrolled by two with independent partial accumulators.
                def edge_pair(i, carry):
                    a0, a1 = carry
                    e0 = start + 2 * i
                    return (a0 + gather_row(e0), a1 + gather_row(e0 + 1))

                a0, a1 = lax.fori_loop(0, n_e // 2, edge_pair, (zero_row, zero_row))
                # Odd remainder edge: clamped (always-valid) read, masked contribution.
                rem = jnp.where(n_e % 2 == 1,
                                gather_row(jnp.maximum(stop - 1, 0)), 0.0)
                acc_row = a0 + a1 + rem
                # Place the finished row at sublane r of the (8, f_pad) group acc.
                return group_acc + jnp.where(sub_iota == r, acc_row, 0.0)

            groups.append(lax.fori_loop(0, 8, row_body,
                                        jnp.zeros((8, f_pad), jnp.float32)))

        agg = jnp.concatenate(groups, axis=0)                # (tm, f_pad)
        hh = jnp.maximum(
            jnp.dot(agg, w1_ref[...], preferred_element_type=jnp.float32) + b1_ref[...],
            0.0)
        out = jnp.dot(hh, w2_ref[...], preferred_element_type=jnp.float32) + b2_ref[...]
        out_ref[...] = out.astype(out_ref.dtype)

    flops = (2 * n_edges * f_pad
             + 2 * n_pad * f_pad * h_pad
             + 2 * n_pad * h_pad * o_pad)
    bytes_accessed = (4 * (n_pad * f_pad + f_pad * h_pad + h_pad + h_pad * o_pad
                           + o_pad + n_pad * o_pad)
                      + 4 * (int(row_ptr.shape[0]) + int(src_sorted.shape[0])))
    resident = 4 * (n_pad * f_pad + f_pad * h_pad + h_pad + h_pad * o_pad + o_pad)
    streamed = 2 * 4 * tm * o_pad

    out_p = pl.pallas_call(
        kernel,
        out_shape=jax.ShapeDtypeStruct((n_pad, o_pad), jnp.float32),
        grid_spec=pltpu.PrefetchScalarGridSpec(
            num_scalar_prefetch=2,
            grid=(n_pad // tm,),
            in_specs=[
                _const_spec((n_pad // 8, 8, f_pad)),  # node table, resident, no 8x pad
                _const_spec((f_pad, h_pad)),          # w1
                _const_spec((1, h_pad)),              # b1
                _const_spec((h_pad, o_pad)),          # w2
                _const_spec((1, o_pad)),              # b2
            ],
            out_specs=pl.BlockSpec((tm, o_pad), lambda i, *_: (i, 0)),
        ),
        compiler_params=pltpu.CompilerParams(
            dimension_semantics=("parallel",),
            vmem_limit_bytes=_vmem_limit(resident + streamed)),
        cost_estimate=pl.CostEstimate(flops=flops, transcendentals=0,
                                      bytes_accessed=bytes_accessed),
    )(row_ptr, src_sorted, nodes_p, w1_p, b1_p, w2_p, b2_p)
    return out_p[:n, :o]


def vanilla_gnn_forward(nodes, edges, w1, b1, w2, b2, *, force_csr=False,
                        dense_max_nodes=2048):
    """nodes: (N, F) f32; edges: (E, 2) int rows of (src, dest).

    Weights are stored transposed vs. PyTorch: w1 (F, H), w2 (H, O); biases 1-D.
    """
    n = nodes.shape[0]
    if (not force_csr) and n <= dense_max_nodes:
        return _forward_dense(nodes, edges, w1, b1, w2, b2)
    return _forward_csr(nodes, edges, w1, b1, w2, b2)


if __name__ == "__main__":
    # Small shapes consistent with the module: N nodes with input_dim features.
    N, INPUT_DIM, HIDDEN_DIM, OUTPUT_DIM = 8, 4, 32, 4

    key = jax.random.PRNGKey(0)
    k_nodes, k_w1, k_b1, k_w2, k_b2 = jax.random.split(key, 5)

    nodes = jax.random.normal(k_nodes, (N, INPUT_DIM), dtype=jnp.float32)

    # Simple deterministic graph: bidirectional ring over the N nodes.
    src = jnp.arange(N, dtype=jnp.int32)
    dst = (src + 1) % N
    edges = jnp.concatenate(
        [jnp.stack([src, dst], axis=1), jnp.stack([dst, src], axis=1)], axis=0
    )  # (2N, 2) rows of (src, dest)

    # Deterministic parameter init (PyTorch-style uniform bounds), stored as
    # (in, out) so the kernel does x @ W + b.
    bound1 = 1.0 / jnp.sqrt(INPUT_DIM)
    bound2 = 1.0 / jnp.sqrt(HIDDEN_DIM)
    w1 = jax.random.uniform(k_w1, (INPUT_DIM, HIDDEN_DIM), jnp.float32, -bound1, bound1)
    b1 = jax.random.uniform(k_b1, (HIDDEN_DIM,), jnp.float32, -bound1, bound1)
    w2 = jax.random.uniform(k_w2, (HIDDEN_DIM, OUTPUT_DIM), jnp.float32, -bound2, bound2)
    b2 = jax.random.uniform(k_b2, (OUTPUT_DIM,), jnp.float32, -bound2, bound2)

    # Run both aggregation paths (dense-adjacency MXU path and CSR gather path).
    out_mxu = vanilla_gnn_forward(nodes, edges, w1, b1, w2, b2)
    out_csr = vanilla_gnn_forward(nodes, edges, w1, b1, w2, b2, force_csr=True)
    jax.block_until_ready((out_mxu, out_csr))

    # Pure-JAX reference of the same semantics.
    summed = jnp.zeros_like(nodes).at[edges[:, 1]].add(nodes[edges[:, 0]])
    ref = jnp.maximum(summed @ w1 + b1, 0.0) @ w2 + b2

    assert out_mxu.shape == ref.shape and out_csr.shape == ref.shape
    err_mxu = float(jnp.max(jnp.abs(out_mxu - ref)))
    err_csr = float(jnp.max(jnp.abs(out_csr - ref)))
    assert jnp.allclose(out_mxu, ref, atol=1e-4, rtol=1e-4), err_mxu
    assert jnp.allclose(out_csr, ref, atol=1e-4, rtol=1e-4), err_csr

    print("KERNEL_OK")
</pallas_src>

<mosaic_0001>
module attributes {stable_mosaic.version = 11 : i64} {
  func.func @kernel(%arg0: i32, %arg1: memref<8x8xf32, #tpu.memory_space<vmem>>, %arg2: memref<8x128xf32, #tpu.memory_space<vmem>>, %arg3: memref<128x128xf32, #tpu.memory_space<vmem>>, %arg4: memref<1x128xf32, #tpu.memory_space<vmem>>, %arg5: memref<128x128xf32, #tpu.memory_space<vmem>>, %arg6: memref<1x128xf32, #tpu.memory_space<vmem>>, %arg7: memref<8x128xf32, #tpu.memory_space<vmem>>) attributes {dimension_semantics = [#tpu.dimension_semantics<parallel>], iteration_bounds = array<i64: 1>, scalar_prefetch = 0 : i64, scratch_operands = 0 : i64, tpu.core_type = #tpu.core_type<tc>, window_params = [{transform_indices = @transform_0, window_bounds = array<i64: 8, 8>}, {pipeline_mode = #tpu.pipeline_mode<synchronous>, transform_indices = @transform_1, window_bounds = array<i64: 8, 128>}, {pipeline_mode = #tpu.pipeline_mode<synchronous>, transform_indices = @transform_2, window_bounds = array<i64: 128, 128>}, {pipeline_mode = #tpu.pipeline_mode<synchronous>, transform_indices = @transform_3, window_bounds = array<i64: 1, 128>}, {pipeline_mode = #tpu.pipeline_mode<synchronous>, transform_indices = @transform_4, window_bounds = array<i64: 128, 128>}, {pipeline_mode = #tpu.pipeline_mode<synchronous>, transform_indices = @transform_5, window_bounds = array<i64: 1, 128>}, {transform_indices = @transform_6, window_bounds = array<i64: 8, 128>}]} {
    %c0 = arith.constant 0 : index
    %c0_0 = arith.constant 0 : index
    %0 = vector.load %arg1[%c0, %c0_0] : memref<8x8xf32, #tpu.memory_space<vmem>>, vector<8x8xf32>
    %c0_1 = arith.constant 0 : index
    %c0_2 = arith.constant 0 : index
    %1 = vector.load %arg2[%c0_1, %c0_2] : memref<8x128xf32, #tpu.memory_space<vmem>>, vector<8x128xf32>
    %cst = arith.constant dense<0.000000e+00> : vector<8x128xf32>
    %2 = tpu.matmul %0, %1, %cst {dimension_numbers = #tpu.dot_dimension_numbers<[1], [0], [0], [1], [0, 0, 1, 1], [], []>} : vector<8x8xf32>, vector<8x128xf32>, vector<8x128xf32> -> vector<8x128xf32>
    %c0_3 = arith.constant 0 : index
    %c0_4 = arith.constant 0 : index
    %3 = vector.load %arg3[%c0_3, %c0_4] : memref<128x128xf32, #tpu.memory_space<vmem>>, vector<128x128xf32>
    %cst_5 = arith.constant dense<0.000000e+00> : vector<8x128xf32>
    %4 = tpu.matmul %2, %3, %cst_5 {dimension_numbers = #tpu.dot_dimension_numbers<[1], [0], [0], [1], [0, 0, 1, 1], [], []>} : vector<8x128xf32>, vector<128x128xf32>, vector<8x128xf32> -> vector<8x128xf32>
    %c0_6 = arith.constant 0 : index
    %c0_7 = arith.constant 0 : index
    %5 = vector.load %arg4[%c0_6, %c0_7] : memref<1x128xf32, #tpu.memory_space<vmem>>, vector<1x128xf32>
    %6 = vector.broadcast %5 : vector<1x128xf32> to vector<8x128xf32>
    %7 = arith.addf %4, %6 : vector<8x128xf32>
    %cst_8 = arith.constant 0.000000e+00 : f32
    %8 = vector.broadcast %cst_8 : f32 to vector<8x128xf32>
    %9 = arith.maximumf %7, %8 : vector<8x128xf32>
    %c0_9 = arith.constant 0 : index
    %c0_10 = arith.constant 0 : index
    %10 = vector.load %arg5[%c0_9, %c0_10] : memref<128x128xf32, #tpu.memory_space<vmem>>, vector<128x128xf32>
    %cst_11 = arith.constant dense<0.000000e+00> : vector<8x128xf32>
    %11 = tpu.matmul %9, %10, %cst_11 {dimension_numbers = #tpu.dot_dimension_numbers<[1], [0], [0], [1], [0, 0, 1, 1], [], []>} : vector<8x128xf32>, vector<128x128xf32>, vector<8x128xf32> -> vector<8x128xf32>
    %c0_12 = arith.constant 0 : index
    %c0_13 = arith.constant 0 : index
    %12 = vector.load %arg6[%c0_12, %c0_13] : memref<1x128xf32, #tpu.memory_space<vmem>>, vector<1x128xf32>
    %13 = vector.broadcast %12 : vector<1x128xf32> to vector<8x128xf32>
    %14 = arith.addf %11, %13 : vector<8x128xf32>
    %c0_14 = arith.constant 0 : index
    %c0_15 = arith.constant 0 : index
    %15 = vector.load %arg7[%c0_14, %c0_15] : memref<8x128xf32, #tpu.memory_space<vmem>>, vector<8x128xf32>
    tpu.vector_store %arg7[%c0_14, %c0_15], %14 {strides = array<i32>} : memref<8x128xf32, #tpu.memory_space<vmem>>, vector<8x128xf32>,
    return
  }
  func.func @transform_0(%arg0: i32) -> (i32, i32) {
    %c0_i32 = arith.constant 0 : i32
    %c0_i32_0 = arith.constant 0 : i32
    return %arg0, %c0_i32 : i32, i32
  }
  func.func @transform_1(%arg0: i32) -> (i32, i32) {
    %c0_i32 = arith.constant 0 : i32
    %c0_i32_0 = arith.constant 0 : i32
    %c0_i32_1 = arith.constant 0 : i32
    return %c0_i32, %c0_i32_0 : i32, i32
  }
  func.func @transform_2(%arg0: i32) -> (i32, i32) {
    %c0_i32 = arith.constant 0 : i32
    %c0_i32_0 = arith.constant 0 : i32
    %c0_i32_1 = arith.constant 0 : i32
    return %c0_i32, %c0_i32_0 : i32, i32
  }
  func.func @transform_3(%arg0: i32) -> (i32, i32) {
    %c0_i32 = arith.constant 0 : i32
    %c0_i32_0 = arith.constant 0 : i32
    %c0_i32_1 = arith.constant 0 : i32
    return %c0_i32, %c0_i32_0 : i32, i32
  }
  func.func @transform_4(%arg0: i32) -> (i32, i32) {
    %c0_i32 = arith.constant 0 : i32
    %c0_i32_0 = arith.constant 0 : i32
    %c0_i32_1 = arith.constant 0 : i32
    return %c0_i32, %c0_i32_0 : i32, i32
  }
  func.func @transform_5(%arg0: i32) -> (i32, i32) {
    %c0_i32 = arith.constant 0 : i32
    %c0_i32_0 = arith.constant 0 : i32
    %c0_i32_1 = arith.constant 0 : i32
    return %c0_i32, %c0_i32_0 : i32, i32
  }
  func.func @transform_6(%arg0: i32) -> (i32, i32) {
    %c0_i32 = arith.constant 0 : i32
    %c0_i32_0 = arith.constant 0 : i32
    return %arg0, %c0_i32 : i32, i32
  }
}

</mosaic_0001>

<bundles_post_ra>
// kernel: tpu_custom_call.1
= control target key start
LH: loop header
LB: loop body
LE: loop exit
PB: predicated region body
PF: predicated region fallthrough
CT: control target
= control target key end

     0   :  { %11 = vsyncpa [#allocation3], 0  ;;  %s776_s0 = inlined_call_operand.hbm [shape: f32[8,8], index: 0, kind: input, shape index: {}]   ;;  %s777_s1 = inlined_call_operand.hbm [shape: f32[8,128], index: 1, kind: input, shape index: {}]   ;;  %s778_s2 = inlined_call_operand.hbm [shape: f32[128,128], index: 2, kind: input, shape index: {}]   ;;  %s779_s3 = inlined_call_operand.vmem [shape: f32[1,128], index: 3, kind: input, shape index: {}]   ;;  %s780_s4 = inlined_call_operand.hbm [shape: f32[128,128], index: 4, kind: input, shape index: {}]   ;;  %s781_s5 = inlined_call_operand.vmem [shape: f32[1,128], index: 5, kind: input, shape index: {}]   ;;  %s782_s6 = inlined_call_operand.hbm [shape: f32[8,128], index: 6, kind: output, shape index: {}]  }
   0x1   :  { %12 = vsyncpa [#allocation6], 0 }
   0x2   :  { %13 = vsyncpa [#allocation9], 0 }
   0x3   :  { %14 = vsyncpa [#allocation4], 0  ;;  %s646_s21 = smov [#allocation5]   ;;  %s647_s23 = smov [#allocation2]  }
   0x4   :  { %s31_s22 = sshll.u32 %s646_s21, 4  ;;  %s21_s24 = sshll.u32 %s647_s23, 4  ;;  %s32_s22 = int_to_ptr.vmem [resolvable:$true] %s31_s22  ;;  %s22_s24 = int_to_ptr.vmem [resolvable:$true] %s21_s24 }
   0x5   :  { %s528_s27 = scalar_lea.hbm %s777_s1, 128 }
   0x6   :  { %p529_p0 = scmp.ne.s32.totalorder %s777_s1, %s528_s27  ;;  %p532_p1 = scmp.lt.u32.totalorder %s528_s27, %s777_s1 }
   0x8   :  { %p534_p2 = pnand %p532_p1, %p529_p0 }
   0xa   :  { %537 = shalt.err (!%p534_p2)
}
   0xb   :  { %s538_s8 = scalar_lea.vmem %s32_s22, 128  ;;  %p543_p4 = scmp.lt.s32.totalorder %s32_s22, %s32_s22 }
   0xc   :  { %p539_p3 = scmp.ne.s32.totalorder %s32_s22, %s538_s8  ;;  %p544_p5 = scmp.lt.s32.totalorder %s538_s8, %s538_s8 }
   0xe   :  { %p545_p6 = por %p544_p5, %p543_p4 }
  0x10   :  { %p546_p7 = pnand %p545_p6, %p539_p3 }
  0x12   :  { %549 = shalt.err (!%p546_p7)
}
  0x13   :  { %34 = dma.hbm_to_vmem [thread:$0]  %s777_s1, 128, %s32_s22, [#allocation6]  }
  0x14   :  { %s550_s13 = scalar_lea.hbm %s776_s0, 128 }
  0x15   :  { %p551_p8 = scmp.ne.s32.totalorder %s776_s0, %s550_s13  ;;  %p554_p9 = scmp.lt.u32.totalorder %s550_s13, %s776_s0 }
  0x17   :  { %p556_p10 = pnand %p554_p9, %p551_p8 }
  0x19   :  { %559 = shalt.err (!%p556_p10)
}
  0x1a   :  { %s560_s18 = scalar_lea.vmem %s22_s24, 128  ;;  %p565_p12 = scmp.lt.s32.totalorder %s22_s24, %s22_s24 }
  0x1b   :  { %p561_p11 = scmp.ne.s32.totalorder %s22_s24, %s560_s18  ;;  %p566_p13 = scmp.lt.s32.totalorder %s560_s18, %s560_s18 }
  0x1d   :  { %p567_p0 = por %p566_p13, %p565_p12 }
  0x1f   :  { %p568_p1 = pnand %p567_p0, %p561_p11 }
  0x21   :  { %571 = shalt.err (!%p568_p1)
}
  0x22   :  { %24 = dma.hbm_to_vmem [thread:$0]  %s776_s0, 128, %s22_s24, [#allocation3]  }
  0x23   :  { %s648_s20 = smov [#allocation7]   ;;  %s572_s25 = scalar_lea.hbm %s778_s2, 2048 }
  0x24   :  { %s40_s21 = sshll.u32 %s648_s20, 4  ;;  %p573_p2 = scmp.ne.s32.totalorder %s778_s2, %s572_s25  ;;  %s41_s21 = int_to_ptr.vmem [resolvable:$true] %s40_s21 }
  0x25   :  { %p576_p3 = scmp.lt.u32.totalorder %s572_s25, %s778_s2 }
  0x27   :  { %p578_p4 = pnand %p576_p3, %p573_p2 }
  0x29   :  { %581 = shalt.err (!%p578_p4)
}
  0x2a   :  { %s582_s30 = scalar_lea.vmem %s41_s21, 2048  ;;  %p587_p6 = scmp.lt.s32.totalorder %s41_s21, %s41_s21 }
  0x2b   :  { %p583_p5 = scmp.ne.s32.totalorder %s41_s21, %s582_s30  ;;  %p588_p7 = scmp.lt.s32.totalorder %s582_s30, %s582_s30 }
  0x2d   :  { %p589_p8 = por %p588_p7, %p587_p6 }
  0x2f   :  { %p590_p9 = pnand %p589_p8, %p583_p5 }
  0x31   :  { %593 = shalt.err (!%p590_p9)
}
  0x32   :  { %s649_s0 = smov 128   ;;  %s650_s24 = smov 8  }
  0x33   :  { %46 = dma.hbm_to_vmem [thread:$0]  %s778_s2, 2048, %s41_s21, [#allocation6], %s649_s0, %s649_s0, %s650_s24  }
  0x34   :  { %s651_s9 = smov [#allocation8]   ;;  %s594_s13 = scalar_lea.hbm %s780_s4, 2048 }
  0x35   :  { %s54_s10 = sshll.u32 %s651_s9, 4  ;;  %p595_p10 = scmp.ne.s32.totalorder %s780_s4, %s594_s13  ;;  %s55_s10 = int_to_ptr.vmem [resolvable:$true] %s54_s10 }
  0x36   :  { %p598_p11 = scmp.lt.u32.totalorder %s594_s13, %s780_s4 }
  0x38   :  { %p600_p12 = pnand %p598_p11, %p595_p10 }
  0x3a   :  { %603 = shalt.err (!%p600_p12)
}
  0x3b   :  { %s604_s18 = scalar_lea.vmem %s55_s10, 2048  ;;  %p609_p0 = scmp.lt.s32.totalorder %s55_s10, %s55_s10 }
  0x3c   :  { %p605_p13 = scmp.ne.s32.totalorder %s55_s10, %s604_s18  ;;  %p610_p1 = scmp.lt.s32.totalorder %s604_s18, %s604_s18 }
  0x3e   :  { %p611_p2 = por %p610_p1, %p609_p0 }
  0x40   :  { %p612_p3 = pnand %p611_p2, %p605_p13 }
  0x42   :  { %615 = shalt.err (!%p612_p3)
}
  0x43   :  { %60 = dma.hbm_to_vmem [thread:$0]  %s780_s4, 2048, %s55_s10, [#allocation9], %s649_s0, %s649_s0, %s650_s24  }
  0x44   :  { %638 = dma.done.wait [#allocation3], 128  }
  0x45   :  { %639 = vsyncadd [#allocation3], 4294967168 }
  0x46   :  { %640 = dma.done.wait [#allocation6], 2176  }
  0x47   :  { %641 = vsyncadd [#allocation6], 4294965120 }
  0x48   :  { %642 = dma.done.wait [#allocation9], 2048  }
  0x49   :  { %643 = vsyncadd [#allocation9], 4294965248  ;;  %v652_v0 = vmov 0.0   ;;  %vm653_vm0 = vmmov 0   ;;  %v654_v1 = vmov 0.0|0.0   ;;  %vm77_vm1 = vcmask 64512  }
  0x4a   :  { %395 = vmatprep.subr.mxu0 %v652_v0  ;;  %397 = vmatprep.mubr.msk.f32.mxu0 %vm653_vm0, %v652_v0  ;;  %v76_v2 = vld [vmem:[#allocation5] sm:$0xff]  ;;  %v75_v3 = vld [vmem:[#allocation2] sm:$0xff]  ;;  %v151_v4 = vld [vmem:[#allocation7] sm:$0xff]  ;;  %s655_s22 = smov [#allocation10]  }
  0x4b   :  { %470 = vmatprep.subr.bf16.mxu1 %v654_v1  ;;  %432 = vmatprep.mubr.msk.f32.mxu1 %vm653_vm0, %v652_v0  ;;  %v152_v5 = vld [vmem:[#allocation7 + $0x8] sm:$0xff]  ;;  %v153_v6 = vld [vmem:[#allocation7 + $0x10] sm:$0xff]  ;;  %v154_v7 = vld [vmem:[#allocation7 + $0x18] sm:$0xff]  ;;  %s345_s23 = sshll.u32 %s655_s22, 4  ;;  %s346_s23 = int_to_ptr.vmem [resolvable:$true] %s345_s23 }
  0x4c   :  { %396 = vmatpush3.msra.mxu0 %v76_v2  ;;  %v471_v8 = vpack.c.bf16 %v152_v5, %v151_v4  ;;  %v474_v9 = vpack.c.bf16 %v154_v7, %v153_v6  ;;  %v155_v10 = vld [vmem:[#allocation7 + $0x20] sm:$0xff]  ;;  %v156_v11 = vld [vmem:[#allocation7 + $0x28] sm:$0xff]  ;;  %v157_v13 = vld [vmem:[#allocation7 + $0x30] sm:$0xff]  ;;  %s616_s25 = scalar_lea.vmem %s346_s23, 128  ;;  %p621_p5 = scmp.lt.s32.totalorder %s346_s23, %s346_s23 }
  0x4d   :  { %398 = vmatmul.mubr.msk.f32.vlgmr.msra.gmra.mrb[0].mxu0 %vm77_vm1, %v75_v3  ;;  %494 = vmatprep.subr.bf16.mxu0 %v654_v1  ;;  %v477_v12 = vpack.c.bf16 %v156_v11, %v155_v10  ;;  %v158_v14 = vld [vmem:[#allocation7 + $0x38] sm:$0xff]  ;;  %v159_v16 = vld [vmem:[#allocation7 + $0x40] sm:$0xff]  ;;  %v160_v17 = vld [vmem:[#allocation7 + $0x48] sm:$0xff]  ;;  %p617_p4 = scmp.ne.s32.totalorder %s346_s23, %s616_s25  ;;  %p622_p6 = scmp.lt.s32.totalorder %s616_s25, %s616_s25 }
  0x4e   :  { %467 = vmatprep.mubr.msk.f32.mxu0 %vm653_vm0, %v652_v0  ;;  %472 = vmatpush3.bf16.msra.mxu1 %v471_v8  ;;  %v480_v15 = vpack.c.bf16 %v158_v14, %v157_v13  ;;  %v483_v18 = vpack.c.bf16 %v160_v17, %v159_v16  ;;  %v161_v19 = vld [vmem:[#allocation7 + $0x50] sm:$0xff]  ;;  %v162_v20 = vld [vmem:[#allocation7 + $0x58] sm:$0xff]  ;;  %v163_v22 = vld [vmem:[#allocation7 + $0x60] sm:$0xff] }
  0x4f   :  { %473 = vmatprep.subr.bf16.mxu1 %v654_v1  ;;  %v486_v21 = vpack.c.bf16 %v162_v20, %v161_v19  ;;  %v164_v23 = vld [vmem:[#allocation7 + $0x68] sm:$0xff]  ;;  %v165_v25 = vld [vmem:[#allocation7 + $0x70] sm:$0xff]  ;;  %v166_v26 = vld [vmem:[#allocation7 + $0x78] sm:$0xff]  ;;  %p623_p7 = por %p622_p6, %p621_p5 }
  0x50   :  { %v489_v24 = vpack.c.bf16 %v164_v23, %v163_v22  ;;  %v492_v27 = vpack.c.bf16 %v166_v26, %v165_v25  ;;  %v245_v28 = vld [vmem:[#allocation8] sm:$0xff]  ;;  %v246_v29 = vld [vmem:[#allocation8 + $0x8] sm:$0xff]  ;;  %v247_v30 = vld [vmem:[#allocation8 + $0x10] sm:$0xff] }
  0x51   :  { %v495_v31 = vpack.c.bf16 %v246_v29, %v245_v28  ;;  %v248_v32 = vld [vmem:[#allocation8 + $0x18] sm:$0xff]  ;;  %v249_v34 = vld [vmem:[#allocation8 + $0x20] sm:$0xff]  ;;  %v250_v35 = vld [vmem:[#allocation8 + $0x28] sm:$0xff]  ;;  %p624_p8 = pnand %p623_p7, %p617_p4 }
  0x52   :  { %475 = vmatpush3.bf16.msra.mxu1 %v474_v9  ;;  %v498_v33 = vpack.c.bf16 %v248_v32, %v247_v30  ;;  %v501_v36 = vpack.c.bf16 %v250_v35, %v249_v34  ;;  %v251_v37 = vld [vmem:[#allocation8 + $0x30] sm:$0xff]  ;;  %v252_v38 = vld [vmem:[#allocation8 + $0x38] sm:$0xff]  ;;  %v253_v40 = vld [vmem:[#allocation8 + $0x40] sm:$0xff] }
  0x53   :  { %476 = vmatprep.subr.bf16.mxu1 %v654_v1  ;;  %496 = vmatpush3.bf16.msra.mxu0 %v495_v31  ;;  %v504_v39 = vpack.c.bf16 %v252_v38, %v251_v37  ;;  %v254_v41 = vld [vmem:[#allocation8 + $0x48] sm:$0xff]  ;;  %v255_v43 = vld [vmem:[#allocation8 + $0x50] sm:$0xff]  ;;  %v256_v44 = vld [vmem:[#allocation8 + $0x58] sm:$0xff] }
  0x54   :  { %497 = vmatprep.subr.bf16.mxu0 %v654_v1  ;;  %v507_v42 = vpack.c.bf16 %v254_v41, %v253_v40  ;;  %v510_v45 = vpack.c.bf16 %v256_v44, %v255_v43  ;;  %v257_v46 = vld [vmem:[#allocation8 + $0x60] sm:$0xff]  ;;  %v258_v47 = vld [vmem:[#allocation8 + $0x68] sm:$0xff]  ;;  %v259_v51 = vld [vmem:[#allocation8 + $0x70] sm:$0xff] }
  0x55   :  { %v513_v48 = vpack.c.bf16 %v258_v47, %v257_v46  ;;  %v260_v52 = vld [vmem:[#allocation8 + $0x78] sm:$0xff]  ;;  %v357_v54 = vld [vmem:[%s779_s3] ss:$0 sm:$0xff] }
  0x56   :  { %478 = vmatpush3.bf16.msra.mxu1 %v477_v12  ;;  %v516_v53 = vpack.c.bf16 %v260_v52, %v259_v51  ;;  %v358_v59 = vld [vmem:[%s781_s5] ss:$0 sm:$0xff] }
  0x57   :  { %479 = vmatprep.subr.bf16.mxu1 %v654_v1  ;;  %499 = vmatpush3.bf16.msra.mxu0 %v498_v33 }
  0x58   :  { %500 = vmatprep.subr.bf16.mxu0 %v654_v1 }
  0x5a   :  { %481 = vmatpush3.bf16.msra.mxu1 %v480_v15 }
  0x5b   :  { %482 = vmatprep.subr.bf16.mxu1 %v654_v1  ;;  %502 = vmatpush3.bf16.msra.mxu0 %v501_v36 }
  0x5c   :  { %503 = vmatprep.subr.bf16.mxu0 %v654_v1 }
  0x5e   :  { %484 = vmatpush3.bf16.msra.mxu1 %v483_v18 }
  0x5f   :  { %485 = vmatprep.subr.bf16.mxu1 %v654_v1  ;;  %505 = vmatpush3.bf16.msra.mxu0 %v504_v39 }
  0x60   :  { %506 = vmatprep.subr.bf16.mxu0 %v654_v1 }
  0x62   :  { %487 = vmatpush3.bf16.msra.mxu1 %v486_v21 }
  0x63   :  { %488 = vmatprep.subr.bf16.mxu1 %v654_v1  ;;  %508 = vmatpush3.bf16.msra.mxu0 %v507_v42 }
  0x64   :  { %509 = vmatprep.subr.bf16.mxu0 %v654_v1 }
  0x66   :  { %490 = vmatpush3.bf16.msra.mxu1 %v489_v24 }
  0x67   :  { %491 = vmatprep.subr.bf16.mxu1 %v654_v1  ;;  %511 = vmatpush3.bf16.msra.mxu0 %v510_v45 }
  0x68   :  { %512 = vmatprep.subr.bf16.mxu0 %v654_v1 }
  0x6a   :  { %493 = vmatpush3.bf16.msra.mxu1 %v492_v27 }
  0x6b   :  { %514 = vmatpush3.bf16.msra.mxu0 %v513_v48 }
  0x6c   :  { %515 = vmatprep.subr.bf16.mxu0 %v654_v1 }
  0x6f   :  { %517 = vmatpush3.bf16.msra.mxu0 %v516_v53 }
 0x120   :  { %v147_v49 = vpop.f32.mrb[0].mxu0 }
 0x121   :  { %v399_v50 = vpop.f32.mrb[1].mxu0  ;;  %433 = vmatmul.mubr.f32.vlgmr.msra.gmra.mrb[0].mxu1 %v147_v49 }
 0x1f4   :  { %v240_v55 = vpop.f32.mrb[0].mxu1 }
 0x1f5   :  { %v241_v56 = vadd.f32 %v357_v54, %v240_v55  ;;  %v434_v57 = vpop.f32.mrb[1].mxu1 }
 0x1f7   :  { %v244_v58 = vmax.f32 %v241_v56, 0.0 }
 0x1f9   :  { %468 = vmatmul.mubr.f32.vlgmr.msra.gmra.mrb[2].mxu0 %v244_v58 }
 0x2cc   :  { %v334_v60 = vpop.f32.mrb[2].mxu0 }
 0x2cd   :  { %v335_v61 = vadd.f32 %v358_v59, %v334_v60  ;;  %v469_v62 = vpop.f32.mrb[3].mxu0 }
 0x2cf   :  { %338 = vst [vmem:[#allocation10] sm:$0xff] %v335_v61 }
 0x2d0   :  { %627 = shalt.err (!%p624_p8)
}
 0x2d1   :  { %s628_s27 = scalar_lea.hbm %s782_s6, 128 }
 0x2d2   :  { %p629_p9 = scmp.ne.s32.totalorder %s782_s6, %s628_s27  ;;  %p632_p10 = scmp.lt.u32.totalorder %s628_s27, %s782_s6 }
 0x2d4   :  { %p634_p11 = pnand %p632_p10, %p629_p9 }
 0x2d6   :  { %637 = shalt.err (!%p634_p11)
}
 0x2d7   :  { %348 = dma.vmem_to_hbm [thread:$0]  %s346_s23, 128, %s782_s6, [#allocation4]  }
 0x2d8   :  { %644 = dma.done.wait [#allocation4], 128  }
 0x2d9   :  { %645 = vsyncadd [#allocation4], 4294967168 }
 0x2da   :  { %352 = vsyncpa [#allocation3], 1 }
 0x2db   :  { %353 = vsyncpa [#allocation6], 1 }
 0x2dc   :  { %354 = vsyncpa [#allocation9], 1 }
 0x2dd   :  { %355 = vsyncpa [#allocation4], 1 }

</bundles_post_ra>
